<compile_context>
chip_gen: v6e
topology: v6e:2x2x1
jax: 0.10.0
libtpu: 0.0.40
codegen_flags: <defaults>
</compile_context>

<pallas_src>
import functools

import numpy as np
import jax
import jax.numpy as jnp
from jax import lax
from jax.experimental import pallas as pl
from jax.experimental.pallas import tpu as pltpu


# ----------------------------- plain-JAX glue --------------------------------

def _make_grid_mesh(n):
    """Small planar grid mesh (synthetic stand-in for load_obj)."""
    xs = np.linspace(-0.6, 0.6, n, dtype=np.float32)
    X, Y = np.meshgrid(xs, xs, indexing="xy")
    Z = 0.1 * np.sin(3.0 * X) * np.cos(3.0 * Y)
    verts = np.stack([X, Y, Z], -1).reshape(-1, 3).astype(np.float32)
    faces = []
    for i in range(n - 1):
        for j in range(n - 1):
            a = i * n + j
            b = a + 1
            c = a + n
            d = c + 1
            faces.append([a, c, b])
            faces.append([b, c, d])
    faces = np.asarray(faces, np.int32)
    uvs = np.stack([(X + 0.6) / 1.2, (Y + 0.6) / 1.2], -1)
    uvs = uvs.reshape(-1, 2).astype(np.float32)
    return jnp.asarray(verts), jnp.asarray(faces), jnp.asarray(uvs)


def face_vertices(attrs, faces):
    # attrs: (N, V, C), faces: (F, 3) int32 -> (N, F, 3, C)
    return attrs[:, faces, :]


def vertex_normals(vertices, faces):
    # vertices: (N, V, 3), faces: (F, 3) -> (N, V, 3)  (DECA util.vertex_normals)
    N, V, _ = vertices.shape
    fv = vertices[:, faces, :]                                  # (N, F, 3, 3)
    v0, v1, v2 = fv[:, :, 0], fv[:, :, 1], fv[:, :, 2]
    n1 = jnp.cross(v2 - v1, v0 - v1)
    n2 = jnp.cross(v0 - v2, v1 - v2)
    n0 = jnp.cross(v1 - v0, v2 - v0)
    normals = jnp.zeros((N, V, 3), jnp.float32)
    normals = normals.at[:, faces[:, 1], :].add(n1)
    normals = normals.at[:, faces[:, 2], :].add(n2)
    normals = normals.at[:, faces[:, 0], :].add(n0)
    nrm = jnp.linalg.norm(normals, axis=-1, keepdims=True)
    return normals / jnp.maximum(nrm, 1e-6)


def project_to_ndc(verts, focal, image_size, dist=10.0):
    """look_at_view_transform(dist, 0, 0) + FoV perspective; NDC z := view z."""
    x_v = -verts[..., 0]
    y_v = verts[..., 1]
    z_v = dist - verts[..., 2]
    s = focal / float(image_size // 2)         # 1 / tan(fov / 2)
    return jnp.stack([s * x_v / z_v, s * y_v / z_v, z_v], axis=-1)


def _round_up(x, m):
    return ((x + m - 1) // m) * m


def _pick_tile(P, prefs):
    for t in prefs:
        if t <= P and P % t == 0:
            return t
    return P


def _device_tuning():
    """(pixel-tile prefs, vmem_limit_bytes, face-chunk cap, use_bf16_mxu)."""
    kind = ""
    try:
        kind = jax.devices()[0].device_kind.lower()
    except Exception:
        pass
    if "v7" in kind:
        # keep the lane axis (TP) large; TF is the real vreg-pressure knob.
        return (1024, 512, 256, 128), 48 * 1024 * 1024, 128, True
    if "v6" in kind:
        return (1024, 512, 256, 128), 96 * 1024 * 1024, 256, True
    if "v5" in kind:
        # single vst slot + no bf16 VPU: small TF, f32 everywhere.
        return (1024, 512, 256, 128), 64 * 1024 * 1024, 128, False
    return (512, 256, 128), 64 * 1024 * 1024, 256, False


# ------------------------------ Pallas kernels --------------------------------

def _rasterize_kernel(overlap_ref, eff_ref, pix_ref, fv_ref, attr_ref,
                      out_ref, zmin_ref, *, TP, TF, D, P_TILES, KT):
    """Binned brute-force rasterization + barycentric attribute interpolation.

    Grid: (N, P_tiles, F_chunks); the face-chunk axis is a reduction carried by
    the resident output block + running z-min scratch; the whole per-chunk body
    is skipped when the scalar-prefetched overlap table says the chunk's screen
    bbox does not touch this pixel tile.

    overlap_ref: (N*P_tiles*KT,) int32 SMEM  bbox overlap flags
    eff_ref    : (N*P_tiles*KT,) int32 SMEM  effective chunk ids (index_map only)
    pix_ref    : (2, TP)               rows [x, y] pixel NDC centers
    fv_ref     : (1, 1, TF, 10)        per-face [a0,b0,c0,a1,b1,c1,dz0,dz1,z2,good]
    attr_ref   : (1, 1, 3, D, TF)      per-corner face attributes
    out_ref    : (1, D+1, TP)          rows 0..D-1 interpolated attrs, row D alpha
    zmin_ref   : (1, TP)               running z-buffer (scratch)
    """
    del eff_ref  # consumed by the index_maps only
    n = pl.program_id(0)
    p = pl.program_id(1)
    k = pl.program_id(2)

    @pl.when(k == 0)
    def _init():
        zmin_ref[...] = jnp.full_like(zmin_ref, 1e30)
        out_ref[...] = jnp.zeros_like(out_ref)

    @pl.when(overlap_ref[(n * P_TILES + p) * KT + k] != 0)
    def _body():
        px = pix_ref[0:1, :]                               # (1, TP)
        py = pix_ref[1:2, :]
        coef = fv_ref[0, 0]                                # (TF, 10)
        a0, b0, c0 = coef[:, 0:1], coef[:, 1:2], coef[:, 2:3]
        a1, b1, c1 = coef[:, 3:4], coef[:, 4:5], coef[:, 5:6]
        dz0, dz1, z2 = coef[:, 6:7], coef[:, 7:8], coef[:, 8:9]
        goodb = coef[:, 9:10] > 0.5                        # (TF, 1)

        # affine barycentrics (reciprocal pre-multiplied in glue)
        w0 = a0 * px + b0 * py + c0                        # (TF, TP)
        w1 = a1 * px + b1 * py + c1
        w2 = 1.0 - w0 - w1
        zpix = z2 + w0 * dz0 + w1 * dz1
        inside = (w0 >= 0.0) & (w1 >= 0.0) & (w2 >= 0.0) & goodb & (zpix > 0.0)

        big = jnp.float32(1e30)
        zm = jnp.where(inside, zpix, big)                  # (TF, TP)
        zmin_c = jnp.min(zm, axis=0, keepdims=True)        # (1, TP)
        is_best = inside & (zm <= zmin_c)
        fcol = lax.broadcasted_iota(jnp.int32, (TF, 1), 0).astype(jnp.float32)
        cand = jnp.where(is_best, fcol, jnp.float32(TF))
        best = jnp.min(cand, axis=0, keepdims=True)
        onehot = ((fcol == best) & is_best).astype(jnp.float32)   # (TF, TP)

        # three accumulated MXU dots against the per-corner attribute slices
        vals = jnp.dot(attr_ref[0, 0, 0], onehot * w0,
                       preferred_element_type=jnp.float32)
        vals = vals + jnp.dot(attr_ref[0, 0, 1], onehot * w1,
                              preferred_element_type=jnp.float32)
        vals = vals + jnp.dot(attr_ref[0, 0, 2], onehot * w2,
                              preferred_element_type=jnp.float32)     # (D, TP)

        zprev = zmin_ref[...]
        better = zmin_c < zprev                            # strict: earlier chunk wins
        zmin_ref[...] = jnp.where(better, zmin_c, zprev)
        out_ref[0, 0:D, :] = jnp.where(better, vals, out_ref[0, 0:D, :])

    @pl.when(k == pl.num_programs(2) - 1)
    def _finish():
        out_ref[0, D:D + 1, :] = (zmin_ref[...] < jnp.float32(1e29)).astype(
            jnp.float32)


def _sample_shade_kernel(rast_ref, tex_ref, out_ref, *, Huv, Wuv, D, use_bf16):
    """grid_sample(align_corners=False, zeros padding) with SEPARABLE bilinear
    weights (wx over texture columns, wy over texture rows), fused with the
    alpha / pos_mask post-processing of Renderer.forward.

    rast_ref: (1, D+1, TP)     raster output (uv rows 0:2, tnz row 5, alpha D)
    tex_ref : (1, 6*Huv, Wuv)  [albedo rgb, face_mask, eyes_mask, fair_mask]
    out_ref : (1, 7, TP)       [albedo rgb, face_mask, eyes, fair, pos_mask]
    """
    rast = rast_ref[0]                                  # (D+1, TP)
    gx = rast[0:1, :]
    gy = rast[1:2, :]
    tnz = rast[5:6, :]
    alpha = rast[D:D + 1, :]

    ix = ((gx + 1.0) * Wuv - 1.0) * 0.5                 # (1, TP)
    iy = ((gy + 1.0) * Huv - 1.0) * 0.5
    ix0 = jnp.floor(ix)
    iy0 = jnp.floor(iy)
    wx1 = ix - ix0
    wy1 = iy - iy0
    wx0 = 1.0 - wx1
    wy0 = 1.0 - wy1

    # integer-valued texel coordinates via in-kernel iotas (f32 compares exact)
    rowv = lax.broadcasted_iota(jnp.int32, (Huv, 1), 0).astype(jnp.float32)
    colv = lax.broadcasted_iota(jnp.int32, (Wuv, 1), 0).astype(jnp.float32)

    # out-of-range corners never match a row/col -> zeros padding semantics
    wy = ((rowv == iy0).astype(jnp.float32) * wy0
          + (rowv == (iy0 + 1.0)).astype(jnp.float32) * wy1)     # (Huv, TP)
    wx = ((colv == ix0).astype(jnp.float32) * wx0
          + (colv == (ix0 + 1.0)).astype(jnp.float32) * wx1)     # (Wuv, TP)

    tex = tex_ref[0]                                    # (6*Huv, Wuv)
    if use_bf16:
        partial = jnp.dot(tex.astype(jnp.bfloat16), wx.astype(jnp.bfloat16),
                          preferred_element_type=jnp.float32)
    else:
        partial = jnp.dot(tex, wx, preferred_element_type=jnp.float32)
    TPx = wx.shape[-1]
    partial = partial.reshape(6, Huv, TPx)              # (6, Huv, TP)
    sampled = jnp.sum(partial * wy[None, :, :], axis=1)  # (6, TP)

    alive = (alpha > 0.0).astype(jnp.float32)           # (1, TP)
    albedo = sampled[0:3, :] * alive
    face_m = sampled[3:4, :] * alive
    eyes_m = sampled[4:5, :] * alive
    fair_m = sampled[5:6, :] * alive

    asum = jnp.sum(albedo, axis=0, keepdims=True)
    tnz_v = jnp.where(asum > 0.0, tnz, -1.0)
    pos = (tnz_v > -0.05).astype(jnp.float32)

    out_ref[0, 0:3, :] = albedo * pos
    out_ref[0, 3:4, :] = face_m
    out_ref[0, 4:5, :] = eyes_m
    out_ref[0, 5:6, :] = fair_m
    out_ref[0, 6:7, :] = pos


# --------------------------------- Renderer -----------------------------------

class Renderer:
    def __init__(self, image_size, uv_size=32, grid_n=4, key=None):
        self.image_size = image_size
        self.uv_size = uv_size
        self.focal = image_size * (1015.0 / 224.0)

        verts, faces, uvs = _make_grid_mesh(grid_n)
        self.base_verts = verts                       # (V, 3)
        self.num_verts = verts.shape[0]
        self.faces = faces                            # (F, 3) int32
        self.raw_uvcoords = uvs[None]                 # (1, V, 2)

        uvc = jnp.concatenate([uvs, jnp.ones_like(uvs[:, :1])], axis=-1)  # (V, 3)
        uvc = uvc * 2.0 - 1.0
        uvc = uvc.at[:, 1].multiply(-1.0)
        self.uvcoords = uvc[None]                     # (1, V, 3)
        self.uvfaces = faces
        self.face_uvcoords = face_vertices(self.uvcoords, self.uvfaces)  # (1,F,3,3)

        if key is None:
            key = jax.random.PRNGKey(0)
        k1, k2, k3 = jax.random.split(key, 3)
        self.uv_face_mask = jax.random.uniform(k1, (1, uv_size, uv_size), jnp.float32)
        self.uv_face_eyes_mask = jax.random.uniform(k2, (1, uv_size, uv_size), jnp.float32)
        self.uv_fair_mask = jax.random.uniform(k3, (1, uv_size, uv_size), jnp.float32)

    def __call__(self, vertices, transformed_vertices, albedos,
                 envmap=None, envmap_intensity=None):
        assert envmap is None  # TODO(synk): add_RENI / sRGB path not implemented
        N = vertices.shape[0]
        H = W = self.image_size
        P = H * W
        faces = self.faces
        F_ = faces.shape[0]

        face_verts = face_vertices(vertices, faces)                    # (N,F,3,3)
        normals = vertex_normals(vertices, faces)                      # (N,V,3)
        face_normals = face_vertices(normals, faces)
        t_normals = vertex_normals(transformed_vertices, faces)
        t_face_normals = face_vertices(t_normals, faces)
        face_uv = jnp.broadcast_to(self.face_uvcoords,
                                   (N,) + self.face_uvcoords.shape[1:])
        attributes = jnp.concatenate(
            [face_uv, t_face_normals, face_verts, face_normals], -1)   # (N,F,3,12)
        D = attributes.shape[-1]

        # ---- tile sizing (per TPU generation) ----
        tp_prefs, vmem_limit, tf_cap, use_bf16 = _device_tuning()
        TP = _pick_tile(P, tp_prefs)                 # pixel tile (lane axis)
        P_tiles = P // TP
        if F_ <= tf_cap:
            TF = _round_up(F_, 8)
            Fpad = TF
        else:
            TF = tf_cap
            Fpad = _round_up(F_, TF)
        KT = Fpad // TF                              # face reduction chunks

        # ---- camera projection + per-face affine edge coefficients (glue) ----
        verts_ndc = project_to_ndc(transformed_vertices, self.focal, self.image_size)
        fv_ndc = verts_ndc[:, faces, :]                                # (N,F,3c,3)
        x0, y0, z0 = fv_ndc[:, :, 0, 0], fv_ndc[:, :, 0, 1], fv_ndc[:, :, 0, 2]
        x1, y1, z1 = fv_ndc[:, :, 1, 0], fv_ndc[:, :, 1, 1], fv_ndc[:, :, 1, 2]
        x2, y2, z2 = fv_ndc[:, :, 2, 0], fv_ndc[:, :, 2, 1], fv_ndc[:, :, 2, 2]
        denom = (y1 - y2) * (x0 - x2) + (x2 - x1) * (y0 - y2)          # (N,F)
        good = jnp.abs(denom) > 1e-12
        inv = jnp.where(good, 1.0 / jnp.where(good, denom, 1.0), 0.0)
        a0 = (y1 - y2) * inv
        b0 = (x2 - x1) * inv
        c0 = -(a0 * x2 + b0 * y2)
        a1 = (y2 - y0) * inv
        b1 = (x0 - x2) * inv
        c1 = -(a1 * x2 + b1 * y2)
        coef = jnp.stack([a0, b0, c0, a1, b1, c1, z0 - z2, z1 - z2, z2,
                          good.astype(jnp.float32)], axis=-1)          # (N,F,10)
        coef = jnp.pad(coef, ((0, 0), (0, Fpad - F_), (0, 0)))
        fv_coef = coef.reshape(N, KT, TF, 10)

        # attributes -> (N, KT, 3, D, TF): corner-major, faces on the lane axis
        attrs_p = jnp.pad(attributes, ((0, 0), (0, Fpad - F_), (0, 0), (0, 0)))
        attrs_t = attrs_p.reshape(N, KT, TF, 3, D).transpose(0, 1, 3, 4, 2)

        # pixel NDC centers (PyTorch3D screen convention: +x left, +y up)
        ii, jj = jnp.meshgrid(jnp.arange(H, dtype=jnp.float32),
                              jnp.arange(W, dtype=jnp.float32), indexing="ij")
        py = 1.0 - (2.0 * ii + 1.0) / H
        px = 1.0 - (2.0 * jj + 1.0) / W
        pix_ndc = jnp.stack([px.reshape(-1), py.reshape(-1)], axis=0)  # (2, P)

        # ---- coarse binning: tile-bbox vs face-chunk-bbox overlap tables ----
        pix_t = pix_ndc.reshape(2, P_tiles, TP)
        t_xmin = jnp.min(pix_t[0], axis=1)
        t_xmax = jnp.max(pix_t[0], axis=1)
        t_ymin = jnp.min(pix_t[1], axis=1)
        t_ymax = jnp.max(pix_t[1], axis=1)
        fx = fv_ndc[..., 0]
        fy = fv_ndc[..., 1]
        f_xmin = jnp.where(good, jnp.min(fx, axis=2), 1e30)
        f_xmax = jnp.where(good, jnp.max(fx, axis=2), -1e30)
        f_ymin = jnp.where(good, jnp.min(fy, axis=2), 1e30)
        f_ymax = jnp.where(good, jnp.max(fy, axis=2), -1e30)
        f_xmin = jnp.pad(f_xmin, ((0, 0), (0, Fpad - F_)), constant_values=1e30)
        f_xmax = jnp.pad(f_xmax, ((0, 0), (0, Fpad - F_)), constant_values=-1e30)
        f_ymin = jnp.pad(f_ymin, ((0, 0), (0, Fpad - F_)), constant_values=1e30)
        f_ymax = jnp.pad(f_ymax, ((0, 0), (0, Fpad - F_)), constant_values=-1e30)
        c_xmin = jnp.min(f_xmin.reshape(N, KT, TF), axis=2)            # (N, KT)
        c_xmax = jnp.max(f_xmax.reshape(N, KT, TF), axis=2)
        c_ymin = jnp.min(f_ymin.reshape(N, KT, TF), axis=2)
        c_ymax = jnp.max(f_ymax.reshape(N, KT, TF), axis=2)
        m = 2.0 / float(min(H, W))          # conservative one-pixel margin
        ov_x = ((c_xmin[:, None, :] <= t_xmax[None, :, None] + m) &
                (c_xmax[:, None, :] >= t_xmin[None, :, None] - m))
        ov_y = ((c_ymin[:, None, :] <= t_ymax[None, :, None] + m) &
                (c_ymax[:, None, :] >= t_ymin[None, :, None] - m))
        overlap = ov_x & ov_y                                          # (N,Pt,KT)
        kidx = jnp.arange(KT, dtype=jnp.int32)
        eff = lax.cummax(jnp.where(overlap, kidx[None, None, :], -1), axis=2)
        eff = jnp.maximum(eff, 0).astype(jnp.int32)
        overlap_flat = overlap.astype(jnp.int32).reshape(-1)           # 1D SMEM
        eff_flat = eff.reshape(-1)

        def pix_map(n, p, k, ov, ef):
            return (0, p)

        def fv_map(n, p, k, ov, ef):
            return (n, ef[(n * P_tiles + p) * KT + k], 0, 0)

        def attr_map(n, p, k, ov, ef):
            return (n, ef[(n * P_tiles + p) * KT + k], 0, 0, 0)

        def out_map(n, p, k, ov, ef):
            return (n, 0, p)

        rendering_flat = pl.pallas_call(
            functools.partial(_rasterize_kernel, TP=TP, TF=TF, D=D,
                              P_TILES=P_tiles, KT=KT),
            out_shape=jax.ShapeDtypeStruct((N, D + 1, P), jnp.float32),
            grid_spec=pltpu.PrefetchScalarGridSpec(
                num_scalar_prefetch=2,
                grid=(N, P_tiles, KT),
                in_specs=[
                    pl.BlockSpec((2, TP), pix_map),
                    pl.BlockSpec((1, 1, TF, 10), fv_map),
                    pl.BlockSpec((1, 1, 3, D, TF), attr_map),
                ],
                out_specs=pl.BlockSpec((1, D + 1, TP), out_map),
                scratch_shapes=[pltpu.VMEM((1, TP), jnp.float32)],
            ),
            compiler_params=pltpu.CompilerParams(
                dimension_semantics=("parallel", "parallel", "arbitrary"),
                vmem_limit_bytes=vmem_limit),
        )(overlap_flat, eff_flat, pix_ndc, fv_coef, attrs_t)

        # ---- texture sampling + masking (Pallas) ----
        Huv = Wuv = self.uv_size
        tex_albedo = albedos.reshape(N, 3, Huv, Wuv)
        masks = jnp.stack([self.uv_face_mask[0],
                           self.uv_face_eyes_mask[0],
                           self.uv_fair_mask[0]], axis=0)[None]        # (1,3,H,W)
        masks = jnp.broadcast_to(masks, (N, 3, Huv, Wuv))
        textures = jnp.concatenate([tex_albedo, masks], axis=1)
        textures = textures.reshape(N, 6 * Huv, Wuv)                   # (N,6H,W)

        shade_flat = pl.pallas_call(
            functools.partial(_sample_shade_kernel, Huv=Huv, Wuv=Wuv, D=D,
                              use_bf16=use_bf16),
            out_shape=jax.ShapeDtypeStruct((N, 7, P), jnp.float32),
            grid_spec=pltpu.PrefetchScalarGridSpec(
                num_scalar_prefetch=0,
                grid=(N, P_tiles),
                in_specs=[
                    pl.BlockSpec((1, D + 1, TP), lambda n, p: (n, 0, p)),
                    pl.BlockSpec((1, 6 * Huv, Wuv), lambda n, p: (n, 0, 0)),
                ],
                out_specs=pl.BlockSpec((1, 7, TP), lambda n, p: (n, 0, p)),
            ),
            compiler_params=pltpu.CompilerParams(
                dimension_semantics=("parallel", "parallel"),
                vmem_limit_bytes=vmem_limit),
        )(rendering_flat, textures)

        # ---- assemble NCHW outputs (channel-major already, no transposes) ----
        rendering = rendering_flat.reshape(N, D + 1, H, W)
        alpha_images = rendering[:, D:D + 1]
        shade = shade_flat.reshape(N, 7, H, W)
        albedo_images = shade[:, 0:3]
        face_mask = shade[:, 3:4]
        face_eyes_mask = shade[:, 4:5]
        fair_mask = shade[:, 5:6]
        pos_mask = shade[:, 6:7]
        images = albedo_images
        shading_images = images
        grid = jnp.transpose(rendering[:, 0:2], (0, 2, 3, 1))          # (N,H,W,2)

        return {
            "images": images,
            "albedo_images": albedo_images,
            "alpha_images": alpha_images,
            "pos_mask": pos_mask,
            "face_mask": face_mask,
            "face_eyes_mask": face_eyes_mask,
            "fair_mask": fair_mask,
            "shading_images": shading_images,
            "grid": grid,
            "normals": normals,
        }


# ----------------------------------- main --------------------------------------

if __name__ == "__main__":
    key = jax.random.PRNGKey(0)
    k_mesh, k_v, k_tv, k_alb = jax.random.split(key, 4)

    image_size = 16
    uv_size = 32
    N = 2

    renderer = Renderer(image_size, uv_size=uv_size, grid_n=4, key=k_mesh)
    V = renderer.num_verts

    vertices = renderer.base_verts[None] + 0.03 * jax.random.normal(
        k_v, (N, V, 3), jnp.float32)
    transformed_vertices = vertices + 0.02 * jax.random.normal(
        k_tv, (N, V, 3), jnp.float32)
    albedos = jax.random.uniform(k_alb, (N, 3, uv_size, uv_size), jnp.float32)

    out = renderer(vertices, transformed_vertices, albedos)
    jax.tree_util.tree_map(lambda x: x.block_until_ready(), out)
    assert out["images"].shape == (N, 3, image_size, image_size)
    assert out["alpha_images"].shape == (N, 1, image_size, image_size)
    assert out["grid"].shape == (N, image_size, image_size, 2)
    print("KERNEL_OK")
</pallas_src>

<mosaic_0001>
module attributes {stable_mosaic.version = 11 : i64} {
  func.func @_rasterize_kernel(%arg0: i32, %arg1: i32, %arg2: i32, %arg3: memref<2xi32, #tpu.memory_space<smem>>, %arg4: memref<2xi32, #tpu.memory_space<smem>>, %arg5: memref<2x256xf32, #tpu.memory_space<vmem>>, %arg6: memref<1x1x24x10xf32, #tpu.memory_space<vmem>>, %arg7: memref<1x1x3x12x24xf32, #tpu.memory_space<vmem>>, %arg8: memref<1x13x256xf32, #tpu.memory_space<vmem>>, %arg9: memref<1x256xf32, #tpu.memory_space<vmem>>) attributes {dimension_semantics = [#tpu.dimension_semantics<parallel>, #tpu.dimension_semantics<parallel>, #tpu.dimension_semantics<arbitrary>], iteration_bounds = array<i64: 2, 1, 1>, scalar_prefetch = 2 : i64, scratch_operands = 1 : i64, tpu.core_type = #tpu.core_type<tc>, window_params = [{transform_indices = @transform_0, window_bounds = array<i64: 2, 256>}, {transform_indices = @transform_1, window_bounds = array<i64: 1, 1, 24, 10>}, {transform_indices = @transform_2, window_bounds = array<i64: 1, 1, 3, 12, 24>}, {transform_indices = @transform_3, window_bounds = array<i64: 1, 13, 256>}]} {
    %c0_i32 = arith.constant 0 : i32
    %0 = arith.cmpi eq, %arg2, %c0_i32 : i32
    %1 = arith.extui %0 : i1 to i32
    %c0_i32_0 = arith.constant 0 : i32
    %2 = arith.cmpi ne, %1, %c0_i32_0 : i32
    scf.if %2 {
      %cst = arith.constant 1.000000e+30 : f32
      %15 = vector.broadcast %cst : f32 to vector<1x256xf32>
      %c0 = arith.constant 0 : index
      %c0_6 = arith.constant 0 : index
      %16 = vector.load %arg9[%c0, %c0_6] : memref<1x256xf32, #tpu.memory_space<vmem>>, vector<1x256xf32>
      tpu.vector_store %arg9[%c0, %c0_6], %15 {strides = array<i32>} : memref<1x256xf32, #tpu.memory_space<vmem>>, vector<1x256xf32>,
      %cst_7 = arith.constant 0.000000e+00 : f32
      %17 = vector.broadcast %cst_7 : f32 to vector<1x13x256xf32>
      %c0_8 = arith.constant 0 : index
      %c0_9 = arith.constant 0 : index
      %c0_10 = arith.constant 0 : index
      %18 = vector.load %arg8[%c0_8, %c0_9, %c0_10] : memref<1x13x256xf32, #tpu.memory_space<vmem>>, vector<1x13x256xf32>
      tpu.vector_store %arg8[%c0_8, %c0_9, %c0_10], %17 {strides = array<i32>} : memref<1x13x256xf32, #tpu.memory_space<vmem>>, vector<1x13x256xf32>,
    } else {
    }
    %c1_i32 = arith.constant 1 : i32
    %3 = arith.muli %arg0, %c1_i32 : i32
    %4 = arith.addi %3, %arg1 : i32
    %c1_i32_1 = arith.constant 1 : i32
    %5 = arith.muli %4, %c1_i32_1 : i32
    %6 = arith.addi %5, %arg2 : i32
    %7 = arith.index_cast %6 : i32 to index
    %8 = memref.load %arg3[%7] : memref<2xi32, #tpu.memory_space<smem>>
    %c0_i32_2 = arith.constant 0 : i32
    %9 = arith.cmpi ne, %8, %c0_i32_2 : i32
    %10 = arith.extui %9 : i1 to i32
    %c0_i32_3 = arith.constant 0 : i32
    %11 = arith.cmpi ne, %10, %c0_i32_3 : i32
    scf.if %11 {
      %c0 = arith.constant 0 : index
      %c0_6 = arith.constant 0 : index
      %15 = vector.load %arg5[%c0, %c0_6] : memref<2x256xf32, #tpu.memory_space<vmem>>, vector<1x256xf32>
      %c1 = arith.constant 1 : index
      %c0_7 = arith.constant 0 : index
      %16 = vector.load %arg5[%c1, %c0_7] : memref<2x256xf32, #tpu.memory_space<vmem>>, vector<1x256xf32>
      %c0_8 = arith.constant 0 : index
      %c0_9 = arith.constant 0 : index
      %c0_10 = arith.constant 0 : index
      %c0_11 = arith.constant 0 : index
      %17 = vector.load %arg6[%c0_8, %c0_9, %c0_10, %c0_11] : memref<1x1x24x10xf32, #tpu.memory_space<vmem>>, vector<1x1x24x10xf32>
      %18 = vector.shape_cast %17 : vector<1x1x24x10xf32> to vector<24x10xf32>
      %19 = vector.extract_strided_slice %18 {offsets = [0, 0], sizes = [24, 1], strides = [1, 1]} : vector<24x10xf32> to vector<24x1xf32>
      %20 = vector.extract_strided_slice %18 {offsets = [0, 1], sizes = [24, 1], strides = [1, 1]} : vector<24x10xf32> to vector<24x1xf32>
      %21 = vector.extract_strided_slice %18 {offsets = [0, 2], sizes = [24, 1], strides = [1, 1]} : vector<24x10xf32> to vector<24x1xf32>
      %22 = vector.extract_strided_slice %18 {offsets = [0, 3], sizes = [24, 1], strides = [1, 1]} : vector<24x10xf32> to vector<24x1xf32>
      %23 = vector.extract_strided_slice %18 {offsets = [0, 4], sizes = [24, 1], strides = [1, 1]} : vector<24x10xf32> to vector<24x1xf32>
      %24 = vector.extract_strided_slice %18 {offsets = [0, 5], sizes = [24, 1], strides = [1, 1]} : vector<24x10xf32> to vector<24x1xf32>
      %25 = vector.extract_strided_slice %18 {offsets = [0, 6], sizes = [24, 1], strides = [1, 1]} : vector<24x10xf32> to vector<24x1xf32>
      %26 = vector.extract_strided_slice %18 {offsets = [0, 7], sizes = [24, 1], strides = [1, 1]} : vector<24x10xf32> to vector<24x1xf32>
      %27 = vector.extract_strided_slice %18 {offsets = [0, 8], sizes = [24, 1], strides = [1, 1]} : vector<24x10xf32> to vector<24x1xf32>
      %28 = vector.extract_strided_slice %18 {offsets = [0, 9], sizes = [24, 1], strides = [1, 1]} : vector<24x10xf32> to vector<24x1xf32>
      %cst = arith.constant 5.000000e-01 : f32
      %29 = vector.broadcast %cst : f32 to vector<24x1xf32>
      %30 = arith.cmpf ogt, %28, %29 : vector<24x1xf32>
      %31 = vector.broadcast %19 : vector<24x1xf32> to vector<24x256xf32>
      %32 = vector.broadcast %15 : vector<1x256xf32> to vector<24x256xf32>
      %33 = arith.mulf %31, %32 : vector<24x256xf32>
      %34 = vector.broadcast %20 : vector<24x1xf32> to vector<24x256xf32>
      %35 = vector.broadcast %16 : vector<1x256xf32> to vector<24x256xf32>
      %36 = arith.mulf %34, %35 : vector<24x256xf32>
      %37 = arith.addf %33, %36 : vector<24x256xf32>
      %38 = vector.broadcast %21 : vector<24x1xf32> to vector<24x256xf32>
      %39 = arith.addf %37, %38 : vector<24x256xf32>
      %40 = vector.broadcast %22 : vector<24x1xf32> to vector<24x256xf32>
      %41 = vector.broadcast %15 : vector<1x256xf32> to vector<24x256xf32>
      %42 = arith.mulf %40, %41 : vector<24x256xf32>
      %43 = vector.broadcast %23 : vector<24x1xf32> to vector<24x256xf32>
      %44 = vector.broadcast %16 : vector<1x256xf32> to vector<24x256xf32>
      %45 = arith.mulf %43, %44 : vector<24x256xf32>
      %46 = arith.addf %42, %45 : vector<24x256xf32>
      %47 = vector.broadcast %24 : vector<24x1xf32> to vector<24x256xf32>
      %48 = arith.addf %46, %47 : vector<24x256xf32>
      %cst_12 = arith.constant 1.000000e+00 : f32
      %49 = vector.broadcast %cst_12 : f32 to vector<24x256xf32>
      %50 = arith.subf %49, %39 : vector<24x256xf32>
      %51 = arith.subf %50, %48 : vector<24x256xf32>
      %52 = vector.broadcast %25 : vector<24x1xf32> to vector<24x256xf32>
      %53 = arith.mulf %39, %52 : vector<24x256xf32>
      %54 = vector.broadcast %27 : vector<24x1xf32> to vector<24x256xf32>
      %55 = arith.addf %54, %53 : vector<24x256xf32>
      %56 = vector.broadcast %26 : vector<24x1xf32> to vector<24x256xf32>
      %57 = arith.mulf %48, %56 : vector<24x256xf32>
      %58 = arith.addf %55, %57 : vector<24x256xf32>
      %cst_13 = arith.constant 0.000000e+00 : f32
      %59 = vector.broadcast %cst_13 : f32 to vector<24x256xf32>
      %60 = arith.cmpf oge, %39, %59 : vector<24x256xf32>
      %cst_14 = arith.constant 0.000000e+00 : f32
      %61 = vector.broadcast %cst_14 : f32 to vector<24x256xf32>
      %62 = arith.cmpf oge, %48, %61 : vector<24x256xf32>
      %63 = arith.andi %60, %62 : vector<24x256xi1>
      %cst_15 = arith.constant 0.000000e+00 : f32
      %64 = vector.broadcast %cst_15 : f32 to vector<24x256xf32>
      %65 = arith.cmpf oge, %51, %64 : vector<24x256xf32>
      %66 = arith.andi %63, %65 : vector<24x256xi1>
      %67 = vector.broadcast %30 : vector<24x1xi1> to vector<24x256xi1>
      %68 = arith.andi %66, %67 : vector<24x256xi1>
      %cst_16 = arith.constant 0.000000e+00 : f32
      %69 = vector.broadcast %cst_16 : f32 to vector<24x256xf32>
      %70 = arith.cmpf ogt, %58, %69 : vector<24x256xf32>
      %71 = arith.andi %68, %70 : vector<24x256xi1>
      %cst_17 = arith.constant 1.000000e+30 : f32
      %72 = vector.broadcast %cst_17 : f32 to vector<24x256xf32>
      %73 = arith.select %71, %58, %72 : vector<24x256xi1>, vector<24x256xf32>
      %cst_18 = arith.constant dense<0x7F800000> : vector<256xf32>
      %74 = vector.multi_reduction <minimumf>, %73, %cst_18 [0] : vector<24x256xf32> to vector<256xf32>
      %75 = vector.shape_cast %74 : vector<256xf32> to vector<1x256xf32>
      %76 = vector.broadcast %75 : vector<1x256xf32> to vector<24x256xf32>
      %77 = arith.cmpf ole, %73, %76 : vector<24x256xf32>
      %78 = arith.andi %71, %77 : vector<24x256xi1>
      %79 = tpu.iota {dimensions = array<i32: 0>} : vector<24x1xi32>
      %80 = arith.sitofp %79 : vector<24x1xi32> to vector<24x1xf32>
      %cst_19 = arith.constant 2.400000e+01 : f32
      %81 = vector.shape_cast %80 : vector<24x1xf32> to vector<24x1xf32>
      %82 = vector.broadcast %81 : vector<24x1xf32> to vector<24x256xf32>
      %83 = vector.broadcast %cst_19 : f32 to vector<24x256xf32>
      %84 = arith.select %78, %82, %83 : vector<24x256xi1>, vector<24x256xf32>
      %cst_20 = arith.constant dense<0x7F800000> : vector<256xf32>
      %85 = vector.multi_reduction <minimumf>, %84, %cst_20 [0] : vector<24x256xf32> to vector<256xf32>
      %86 = vector.shape_cast %85 : vector<256xf32> to vector<1x256xf32>
      %87 = vector.broadcast %80 : vector<24x1xf32> to vector<24x256xf32>
      %88 = vector.broadcast %86 : vector<1x256xf32> to vector<24x256xf32>
      %89 = arith.cmpf oeq, %87, %88 : vector<24x256xf32>
      %90 = arith.andi %89, %78 : vector<24x256xi1>
      %91 = arith.extui %90 : vector<24x256xi1> to vector<24x256xi32>
      %92 = arith.sitofp %91 : vector<24x256xi32> to vector<24x256xf32>
      %c0_21 = arith.constant 0 : index
      %c0_22 = arith.constant 0 : index
      %c0_23 = arith.constant 0 : index
      %c0_24 = arith.constant 0 : index
      %c0_25 = arith.constant 0 : index
      %93 = vector.load %arg7[%c0_21, %c0_22, %c0_23, %c0_24, %c0_25] : memref<1x1x3x12x24xf32, #tpu.memory_space<vmem>>, vector<1x1x1x12x24xf32>
      %94 = vector.shape_cast %93 : vector<1x1x1x12x24xf32> to vector<12x24xf32>
      %95 = arith.mulf %92, %39 : vector<24x256xf32>
      %cst_26 = arith.constant dense<0.000000e+00> : vector<12x256xf32>
      %96 = tpu.matmul %94, %95, %cst_26 {dimension_numbers = #tpu.dot_dimension_numbers<[1], [0], [0], [1], [0, 0, 1, 1], [], []>} : vector<12x24xf32>, vector<24x256xf32>, vector<12x256xf32> -> vector<12x256xf32>
      %c0_27 = arith.constant 0 : index
      %c0_28 = arith.constant 0 : index
      %c1_29 = arith.constant 1 : index
      %c0_30 = arith.constant 0 : index
      %c0_31 = arith.constant 0 : index
      %97 = vector.load %arg7[%c0_27, %c0_28, %c1_29, %c0_30, %c0_31] : memref<1x1x3x12x24xf32, #tpu.memory_space<vmem>>, vector<1x1x1x12x24xf32>
      %98 = vector.shape_cast %97 : vector<1x1x1x12x24xf32> to vector<12x24xf32>
      %99 = arith.mulf %92, %48 : vector<24x256xf32>
      %cst_32 = arith.constant dense<0.000000e+00> : vector<12x256xf32>
      %100 = tpu.matmul %98, %99, %cst_32 {dimension_numbers = #tpu.dot_dimension_numbers<[1], [0], [0], [1], [0, 0, 1, 1], [], []>} : vector<12x24xf32>, vector<24x256xf32>, vector<12x256xf32> -> vector<12x256xf32>
      %101 = arith.addf %96, %100 : vector<12x256xf32>
      %c0_33 = arith.constant 0 : index
      %c0_34 = arith.constant 0 : index
      %c2 = arith.constant 2 : index
      %c0_35 = arith.constant 0 : index
      %c0_36 = arith.constant 0 : index
      %102 = vector.load %arg7[%c0_33, %c0_34, %c2, %c0_35, %c0_36] : memref<1x1x3x12x24xf32, #tpu.memory_space<vmem>>, vector<1x1x1x12x24xf32>
      %103 = vector.shape_cast %102 : vector<1x1x1x12x24xf32> to vector<12x24xf32>
      %104 = arith.mulf %92, %51 : vector<24x256xf32>
      %cst_37 = arith.constant dense<0.000000e+00> : vector<12x256xf32>
      %105 = tpu.matmul %103, %104, %cst_37 {dimension_numbers = #tpu.dot_dimension_numbers<[1], [0], [0], [1], [0, 0, 1, 1], [], []>} : vector<12x24xf32>, vector<24x256xf32>, vector<12x256xf32> -> vector<12x256xf32>
      %106 = arith.addf %101, %105 : vector<12x256xf32>
      %c0_38 = arith.constant 0 : index
      %c0_39 = arith.constant 0 : index
      %107 = vector.load %arg9[%c0_38, %c0_39] : memref<1x256xf32, #tpu.memory_space<vmem>>, vector<1x256xf32>
      %108 = arith.cmpf olt, %75, %107 : vector<1x256xf32>
      %109 = arith.select %108, %75, %107 : vector<1x256xi1>, vector<1x256xf32>
      %c0_40 = arith.constant 0 : index
      %c0_41 = arith.constant 0 : index
      %110 = vector.load %arg9[%c0_40, %c0_41] : memref<1x256xf32, #tpu.memory_space<vmem>>, vector<1x256xf32>
      tpu.vector_store %arg9[%c0_40, %c0_41], %109 {strides = array<i32>} : memref<1x256xf32, #tpu.memory_space<vmem>>, vector<1x256xf32>,
      %c0_42 = arith.constant 0 : index
      %c0_43 = arith.constant 0 : index
      %c0_44 = arith.constant 0 : index
      %111 = vector.load %arg8[%c0_42, %c0_43, %c0_44] : memref<1x13x256xf32, #tpu.memory_space<vmem>>, vector<1x12x256xf32>
      %112 = vector.shape_cast %111 : vector<1x12x256xf32> to vector<12x256xf32>
      %113 = vector.shape_cast %108 : vector<1x256xi1> to vector<1x256xi1>
      %114 = vector.broadcast %113 : vector<1x256xi1> to vector<12x256xi1>
      %115 = arith.select %114, %106, %112 : vector<12x256xi1>, vector<12x256xf32>
      %c0_45 = arith.constant 0 : index
      %c0_46 = arith.constant 0 : index
      %c0_47 = arith.constant 0 : index
      %116 = vector.load %arg8[%c0_45, %c0_46, %c0_47] : memref<1x13x256xf32, #tpu.memory_space<vmem>>, vector<1x12x256xf32>
      %117 = vector.shape_cast %116 : vector<1x12x256xf32> to vector<12x256xf32>
      %118 = vector.shape_cast %115 : vector<12x256xf32> to vector<1x12x256xf32>
      tpu.vector_store %arg8[%c0_45, %c0_46, %c0_47], %118 {strides = array<i32>} : memref<1x13x256xf32, #tpu.memory_space<vmem>>, vector<1x12x256xf32>,
    } else {
    }
    %c0_i32_4 = arith.constant 0 : i32
    %12 = arith.cmpi eq, %arg2, %c0_i32_4 : i32
    %13 = arith.extui %12 : i1 to i32
    %c0_i32_5 = arith.constant 0 : i32
    %14 = arith.cmpi ne, %13, %c0_i32_5 : i32
    scf.if %14 {
      %c0 = arith.constant 0 : index
      %c0_6 = arith.constant 0 : index
      %15 = vector.load %arg9[%c0, %c0_6] : memref<1x256xf32, #tpu.memory_space<vmem>>, vector<1x256xf32>
      %cst = arith.constant 1.000000e+29 : f32
      %16 = vector.broadcast %cst : f32 to vector<1x256xf32>
      %17 = arith.cmpf olt, %15, %16 : vector<1x256xf32>
      %18 = arith.extui %17 : vector<1x256xi1> to vector<1x256xi32>
      %19 = arith.sitofp %18 : vector<1x256xi32> to vector<1x256xf32>
      %c0_7 = arith.constant 0 : index
      %c12 = arith.constant 12 : index
      %c0_8 = arith.constant 0 : index
      %20 = vector.load %arg8[%c0_7, %c12, %c0_8] : memref<1x13x256xf32, #tpu.memory_space<vmem>>, vector<1x1x256xf32>
      %21 = vector.shape_cast %20 : vector<1x1x256xf32> to vector<1x256xf32>
      %22 = vector.shape_cast %19 : vector<1x256xf32> to vector<1x1x256xf32>
      tpu.vector_store %arg8[%c0_7, %c12, %c0_8], %22 {strides = array<i32>} : memref<1x13x256xf32, #tpu.memory_space<vmem>>, vector<1x1x256xf32>,
    } else {
    }
    return
  }
  func.func @transform_0(%arg0: i32, %arg1: i32, %arg2: i32, %arg3: memref<2xi32, #tpu.memory_space<smem>>, %arg4: memref<2xi32, #tpu.memory_space<smem>>) -> (i32, i32) {
    %c0_i32 = arith.constant 0 : i32
    %c0_i32_0 = arith.constant 0 : i32
    return %c0_i32, %arg1 : i32, i32
  }
  func.func @transform_1(%arg0: i32, %arg1: i32, %arg2: i32, %arg3: memref<2xi32, #tpu.memory_space<smem>>, %arg4: memref<2xi32, #tpu.memory_space<smem>>) -> (i32, i32, i32, i32) {
    %c1_i32 = arith.constant 1 : i32
    %0 = arith.muli %arg0, %c1_i32 : i32
    %1 = arith.addi %0, %arg1 : i32
    %c1_i32_0 = arith.constant 1 : i32
    %2 = arith.muli %1, %c1_i32_0 : i32
    %3 = arith.addi %2, %arg2 : i32
    %4 = arith.index_cast %3 : i32 to index
    %5 = memref.load %arg4[%4] : memref<2xi32, #tpu.memory_space<smem>>
    %c0_i32 = arith.constant 0 : i32
    %c0_i32_1 = arith.constant 0 : i32
    %c0_i32_2 = arith.constant 0 : i32
    return %arg0, %5, %c0_i32, %c0_i32_1 : i32, i32, i32, i32
  }
  func.func @transform_2(%arg0: i32, %arg1: i32, %arg2: i32, %arg3: memref<2xi32, #tpu.memory_space<smem>>, %arg4: memref<2xi32, #tpu.memory_space<smem>>) -> (i32, i32, i32, i32, i32) {
    %c1_i32 = arith.constant 1 : i32
    %0 = arith.muli %arg0, %c1_i32 : i32
    %1 = arith.addi %0, %arg1 : i32
    %c1_i32_0 = arith.constant 1 : i32
    %2 = arith.muli %1, %c1_i32_0 : i32
    %3 = arith.addi %2, %arg2 : i32
    %4 = arith.index_cast %3 : i32 to index
    %5 = memref.load %arg4[%4] : memref<2xi32, #tpu.memory_space<smem>>
    %c0_i32 = arith.constant 0 : i32
    %c0_i32_1 = arith.constant 0 : i32
    %c0_i32_2 = arith.constant 0 : i32
    %c0_i32_3 = arith.constant 0 : i32
    return %arg0, %5, %c0_i32, %c0_i32_1, %c0_i32_2 : i32, i32, i32, i32, i32
  }
  func.func @transform_3(%arg0: i32, %arg1: i32, %arg2: i32, %arg3: memref<2xi32, #tpu.memory_space<smem>>, %arg4: memref<2xi32, #tpu.memory_space<smem>>) -> (i32, i32, i32) {
    %c0_i32 = arith.constant 0 : i32
    %c0_i32_0 = arith.constant 0 : i32
    return %arg0, %c0_i32, %arg1 : i32, i32, i32
  }
}

</mosaic_0001>

<bundles_post_ra>
// kernel: tpu_custom_call.1
= control target key start
LH: loop header
LB: loop body
LE: loop exit
PB: predicated region body
PF: predicated region fallthrough
CT: control target
= control target key end

     0   :  { %s1883_s0 = inlined_call_operand.vmem [shape: s32[2], index: 0, kind: input, shape index: {}]   ;;  %s1884_s2 = inlined_call_operand.vmem [shape: f32[2,256], index: 2, kind: input, shape index: {}]   ;;  %s1885_s3 = inlined_call_operand.vmem [shape: f32[2,1,24,10], index: 3, kind: input, shape index: {}]   ;;  %s1886_s4 = inlined_call_operand.vmem [shape: f32[2,1,3,12,24], index: 4, kind: input, shape index: {}]   ;;  %s1887_s5 = inlined_call_operand.vmem [shape: f32[2,13,256], index: 5, kind: output, shape index: {}]   ;;  %s1888_s1 = inlined_call_operand.vmem [shape: s32[2], index: 1, kind: input, shape index: {}]  }
   0x1   :  { %s10_s20 = sshll.u32 %s1883_s0, 4  ;;  %s14_s23 = sshll.u32 %s1888_s1, 4  ;;  %s11_s20 = int_to_ptr.vmem [resolvable:$true] %s10_s20  ;;  %s15_s23 = int_to_ptr.vmem [resolvable:$true] %s14_s23 }
   0x2   :  { %s1313_s24 = scalar_lea.vmem %s11_s20, 16  ;;  %p1318_p1 = scmp.lt.s32.totalorder %s11_s20, %s11_s20 }
   0x3   :  { %p1314_p0 = scmp.ne.s32.totalorder %s11_s20, %s1313_s24  ;;  %p1319_p2 = scmp.lt.s32.totalorder %s1313_s24, %s1313_s24 }
   0x5   :  { %p1320_p3 = por %p1319_p2, %p1318_p1 }
   0x7   :  { %p1321_p4 = pnand %p1320_p3, %p1314_p0 }
   0x9   :  { %1324 = shalt.err (!%p1321_p4)  }
   0xa   :  { %s1363_s25 = smov [#allocation4]   ;;  %s1325_s26 = scalar_lea.vmem %s15_s23, 16 }
   0xb   :  { %13 = dma.vmem_to_smem %s11_s20, 16, %s1363_s25, [#allocation3] }
   0xc   :  { %p1326_p5 = scmp.ne.s32.totalorder %s15_s23, %s1325_s26  ;;  %p1330_p6 = scmp.lt.s32.totalorder %s15_s23, %s15_s23 }
   0xd   :  { %p1331_p7 = scmp.lt.s32.totalorder %s1325_s26, %s1325_s26 }
   0xf   :  { %p1332_p8 = por %p1331_p7, %p1330_p6 }
  0x11   :  { %p1333_p9 = pnand %p1332_p8, %p1326_p5 }
  0x13   :  { %1336 = shalt.err (!%p1333_p9)  }
  0x14   :  { %s1364_s0 = smov [#allocation5]  }
  0x15   :  { %17 = dma.vmem_to_smem %s15_s23, 16, %s1364_s0, [#allocation3] }
  0x16   :  { %1349 = dma.done.wait [#allocation3], 32 }
  0x17   :  { %1350 = vsyncadd [#allocation3], 4294967264 }
  0x18   :  { %19 = sfence }
  0x19   :  { %s1415_s1 = smov 0   ;;  %s1417_s27 = smov 0  }
  0x1a   :  { %s1419_s28 = smov 0  }
  0x1b LB: > { %s44_s29 = sadd.s32 1, %s1357_s27  ;;  %p1212_p10 = scmp.ge.s32.totalorder %s1361_s28, 1  ;;  %s1361_s28 = sphi %s1419_s28, %s25_s28   ;;  %s1357_s27 = sphi %s1417_s27, %s1944_s27   ;;  %s1353_s1 = sphi %s1415_s1, %s1943_s1  }
  0x1c   : > { %p46_p11 = scmp.ge.s32.totalorder %s44_s29, 2  ;;  %p227_p12 = scmp.lt.s32.totalorder %s1361_s28, 3 }
  0x1e   : > { %s1946_s29 = smov (%p46_p11, %s44_s29), 0  ;;  %p228_p13 = pnand %p1212_p10, %p227_p12 }
  0x1f   : > { %s287_s30 = sld [smem:[#allocation5 + %s1353_s1]] (!%p228_p13)  ;;  %p288_p0 = scmp.lt.s32.totalorder (!%p228_p13), %s1353_s1, 1 }
  0x20   : > { %231 = sbr.rel (%p228_p13) target bundleno = 529 (0x211), region = 32  ;;  %s302_s6 = sld [smem:[#allocation5 + %s1353_s1]] (!%p228_p13) }
  0x21   : > { %s340_s8 = sld [smem:[#allocation4 + %s1353_s1]] (!%p228_p13) }
  0x25   : > { %v329_v0 = vlaneseq  ;;  %v1892_v1 = vmov 0  ;;  %s289_s7 = scalar_select %p288_p0, %s1353_s1, 1  ;;  %v1365_v2 = vmov 1e+30   ;;  %v1366_v3 = vmov 0.0  }
  0x26   : > { %p290_p1 = scmp.lt.s32.totalorder %s287_s30, 0  ;;  %p305_p2 = scmp.lt.s32.totalorder %s302_s6, 0 }
  0x27   : > { %vm1434_vm0 = vcmp.lt.s32.totalorder %v329_v0, 256  ;;  %s1239_s9 = sshll.u32 %s289_s7, 5  ;;  %s1247_s13 = smul.u32 3, %s289_s7 }
  0x28   : > { %v1893_v1 = vsel %vm1434_vm0, 4294967295, %v1892_v1  ;;  %333 = vst.msk [vmem:[#allocation2] sm:$0x3] %vm1434_vm0, %v1365_v2  ;;  %s1443_s12 = scalar_lea.vmem %s1887_s5, %s1239_s9  ;;  %s1249_s14 = smul.u32 6, %s289_s7 }
  0x29   : > { %334 = vst [vmem:[%s1443_s12] sm:$0xff] %v1366_v3  ;;  %335 = vst [vmem:[%s1443_s12 + $0x8] sm:$0xff] %v1366_v3  ;;  %s1948_s30 = smov (!%p290_p1, %s287_s30), 0  ;;  %s1950_s6 = smov (!%p305_p2, %s302_s6), 0 }
  0x2a   : > { %336 = vst [vmem:[%s1443_s12 + $0x10] sm:$0x1f] %v1366_v3  ;;  %337 = vst [vmem:[%s1443_s12 + $0x18] sm:$0x1f] %v1366_v3  ;;  %s1246_s15 = smul.u32 3, %s1948_s30  ;;  %p1217_p3 = scmp.eq.s32.totalorder %s340_s8, 0 }
  0x2b   : > { %s1248_s16 = smul.u32 6, %s1950_s6 }
  0x2c   : > { %s294_s17 = sadd.s32 %s1247_s13, %s1246_s15  ;;  %344 = sbr.rel (%p1217_p3) target bundleno = 525 (0x20d), region = 40 }
  0x2d   : > { %s1213_s18 = sshll.u32 %s294_s17, 3  ;;  %s309_s19 = sadd.s32 %s1249_s14, %s1248_s16 }
  0x2e   : > { %s296_s22 = scalar_lea.vmem %s1885_s3, %s1213_s18  ;;  %s1214_s23 = sshll.u32 %s309_s19, 3 }
  0x2f   : > { %s1459_s26 = scalar_lea.vmem %s1886_s4, %s1214_s23 }
  0x31   : > { %v348_v4 = vld [vmem:[%s296_s22] sm:$0xff]  ;;  %v1367_v5 = vmov 1   ;;  %v1368_v6 = vmov 0   ;;  %v350_v7 = vld [vmem:[%s296_s22 + $0x10] sm:$0xff]  ;;  %v349_v8 = vld [vmem:[%s296_s22 + $0x8] sm:$0xff]  ;;  %v1369_v9 = vmov 3  }
  0x32   : > { %1291 = vset.pattern.permute.xlu1 %v1367_v5  ;;  %1290 = vset.pattern.permute.xlu0 %v1368_v6  ;;  %v1370_v10 = vmov 4   ;;  %v1371_v11 = vmov 2   ;;  %v1372_v12 = vmov 5   ;;  %v1373_v13 = vmov 6  }
  0x33   : > { %387 = vperm.xlu1 %1291, %v348_v4   ;;  %356 = vperm.xlu0 %1290, %v348_v4   ;;  %v1374_v14 = vmov 8   ;;  %v1375_v15 = vmov 7   ;;  %vm351_vm1 = vcmp.gt.f32.partialorder %v348_v4, 0.5  ;;  %v1376_v17 = vmov 9  }
  0x34   : > { %v601_v16 = vsel %vm351_vm1, 1, %v1368_v6  ;;  %vm353_vm2 = vcmp.gt.f32.partialorder %v350_v7, 0.5  ;;  %vm352_vm3 = vcmp.gt.f32.partialorder %v349_v8, 0.5  ;;  %v1377_v20 = vmov 0.0  }
  0x35   : > { %v603_v18 = vsel %vm353_vm2, 1, %v1368_v6  ;;  %v602_v19 = vsel %vm352_vm3, 1, %v1368_v6  ;;  %809 = vmatprep.mubr.f32.mxu0 %v1377_v20  ;;  %892 = vmatprep.mubr.f32.mxu1 %v1377_v20  ;;  %v1472_v35 = vshrl.u32 %v329_v0, 7  ;;  %v1218_v40 = vld [vmem:[%s1884_s2 + $0x1] ss:$2 sm:$0x3] }
  0x36   : > { %v345_v41 = vld [vmem:[%s1884_s2] ss:$2 sm:$0x3] }
  0x37   : > { %395 = vperm.xlu1 %1291, %v350_v7   ;;  %366 = vperm.xlu0 %1290, %v350_v7   ;;  %v1477_v38 = vsub.s32 0, %v1472_v35  ;;  %v1480_v39 = vsub.s32 1, %v1472_v35 }
  0x39   : > { %v402_v43 = vrot.slane %v1218_v40, %v1477_v38  ;;  %v406_v44 = vrot.slane %v1218_v40, %v1480_v39  ;;  %v373_v45 = vrot.slane %v345_v41, %v1477_v38  ;;  %v377_v46 = vrot.slane %v345_v41, %v1480_v39 }
  0x3b   : > { %391 = vperm.xlu1 %1291, %v349_v8   ;;  %361 = vperm.xlu0 %1290, %v349_v8  }
  0x3f   : > { %1292 = vset.pattern.permute.xlu1 %v1369_v9  ;;  %1294 = vset.pattern.permute.xlu0 %v1370_v10 }
  0x40   : > { %448 = vperm.xlu1 %1292, %v350_v7   ;;  %466 = vperm.xlu0 %1294, %v350_v7  }
  0x44   : > { %1293 = vset.pattern.permute.xlu1 %v1370_v10  ;;  %1295 = vset.pattern.permute.xlu0 %v1369_v9 }
  0x45   : > { %458 = vperm.xlu1 %1293, %v348_v4   ;;  %440 = vperm.xlu0 %1295, %v348_v4  }
  0x49   : > { %1296 = vset.pattern.permute.xlu1 %v1371_v11  ;;  %444 = vperm.xlu0 %1295, %v349_v8  }
  0x4a   : > { %422 = vperm.xlu1 %1296, %v348_v4  }
  0x4d   : > { %1299 = vset.pattern.permute.xlu0 %v1372_v12 }
  0x4e   : > { %430 = vperm.xlu1 %1296, %v350_v7   ;;  %482 = vperm.xlu0 %1299, %v348_v4  }
  0x52   : > { %1297 = vset.pattern.permute.xlu1 %v1370_v10  ;;  %1302 = vset.pattern.permute.xlu0 %v1373_v13 }
  0x53   : > { %462 = vperm.xlu1 %1297, %v349_v8   ;;  %520 = vperm.xlu0 %1302, %v350_v7  }
  0x57   : > { %1298 = vset.pattern.permute.xlu1 %v1371_v11  ;;  %1305 = vset.pattern.permute.xlu0 %v1374_v14 }
  0x58   : > { %426 = vperm.xlu1 %1298, %v349_v8   ;;  %530 = vperm.xlu0 %1305, %v348_v4  }
  0x5c   : > { %1300 = vset.pattern.permute.xlu1 %v1372_v12  ;;  %1308 = vset.pattern.permute.xlu0 %v1375_v15 }
  0x5d   : > { %490 = vperm.xlu1 %1300, %v350_v7   ;;  %556 = vperm.xlu0 %1308, %v350_v7  }
  0x61   : > { %1301 = vset.pattern.permute.xlu1 %v1373_v13  ;;  %1311 = vset.pattern.permute.xlu0 %v1376_v17 }
  0x62   : > { %512 = vperm.xlu1 %1301, %v348_v4   ;;  %605 = vperm.xlu0 %1311, %v601_v16  }
  0x66   : > { %1303 = vset.pattern.permute.xlu1 %v1372_v12 }
  0x67   : > { %486 = vperm.xlu1 %1303, %v349_v8  }
  0x6b   : > { %1304 = vset.pattern.permute.xlu1 %v1373_v13 }
  0x6c   : > { %516 = vperm.xlu1 %1304, %v349_v8  }
  0x70   : > { %1306 = vset.pattern.permute.xlu1 %v1374_v14 }
  0x71   : > { %538 = vperm.xlu1 %1306, %v350_v7  }
  0x75   : > { %1307 = vset.pattern.permute.xlu1 %v1375_v15 }
  0x76   : > { %548 = vperm.xlu1 %1307, %v348_v4  }
  0x7a   : > { %1309 = vset.pattern.permute.xlu1 %v1374_v14 }
  0x7b   : > { %534 = vperm.xlu1 %1309, %v349_v8  }
  0x7f   : > { %1310 = vset.pattern.permute.xlu1 %v1375_v15 }
  0x80   : > { %552 = vperm.xlu1 %1310, %v349_v8  }
  0x84   : > { %1312 = vset.pattern.permute.xlu1 %v1376_v17 }
  0x85   : > { %611 = vperm.xlu1 %1312, %v603_v18  }
  0x89   : > { %608 = vperm.xlu1 %1312, %v602_v19  }
  0xae   : > { %v388_v21 = vpop.permute.xlu1 %387  ;;  %v357_v24 = vpop.permute.xlu0 %356 }
  0xaf   : > { %v409_v48 = vmul.f32 %v402_v43, %v388_v21  ;;  %v410_v49 = vmul.f32 %v406_v44, %v388_v21  ;;  %v380_v50 = vmul.f32 %v373_v45, %v357_v24  ;;  %v381_v51 = vmul.f32 %v377_v46, %v357_v24 }
  0xb1   : > { %v415_v58 = vadd.f32 %v409_v48, %v380_v50  ;;  %v416_v59 = vadd.f32 %v410_v49, %v381_v51 }
  0xb2   : > { %v396_v22 = vpop.permute.xlu1 %395  ;;  %v367_v26 = vpop.permute.xlu0 %366 }
  0xb3   : > { %v413_v60 = vmul.f32 %v402_v43, %v396_v22  ;;  %v414_v61 = vmul.f32 %v406_v44, %v396_v22  ;;  %v384_v62 = vmul.f32 %v373_v45, %v367_v26  ;;  %v385_v63 = vmul.f32 %v377_v46, %v367_v26 }
  0xb5   : > { %v419_v15 = vadd.f32 %v413_v60, %v384_v62  ;;  %v420_v22 = vadd.f32 %v414_v61, %v385_v63 }
  0xb6   : > { %v392_v23 = vpop.permute.xlu1 %391  ;;  %v362_v28 = vpop.permute.xlu0 %361 }
  0xb7   : > { %v411_v14 = vmul.f32 %v402_v43, %v392_v23  ;;  %v412_v17 = vmul.f32 %v406_v44, %v392_v23  ;;  %v382_v18 = vmul.f32 %v373_v45, %v362_v28  ;;  %v383_v19 = vmul.f32 %v377_v46, %v362_v28 }
  0xb9   : > { %v417_v48 = vadd.f32 %v411_v14, %v382_v18  ;;  %v418_v49 = vadd.f32 %v412_v17, %v383_v19 }
  0xbb   : > { %v449_v25 = vpop.permute.xlu1 %448  ;;  %v467_v31 = vpop.permute.xlu0 %466 }
  0xbc   : > { %v455_v2 = vmul.f32 %v449_v25, %v373_v45  ;;  %v456_v4 = vmul.f32 %v449_v25, %v377_v46  ;;  %v473_v9 = vmul.f32 %v467_v31, %v402_v43  ;;  %v474_v10 = vmul.f32 %v467_v31, %v406_v44 }
  0xbe   : > { %v479_v24 = vadd.f32 %v473_v9, %v455_v2  ;;  %v480_v25 = vadd.f32 %v474_v10, %v456_v4 }
  0xc0   : > { %v459_v27 = vpop.permute.xlu1 %458  ;;  %v441_v33 = vpop.permute.xlu0 %440 }
  0xc1   : > { %v469_v54 = vmul.f32 %v459_v27, %v402_v43  ;;  %v451_v55 = vmul.f32 %v441_v33, %v373_v45  ;;  %v470_v56 = vmul.f32 %v459_v27, %v406_v44  ;;  %v452_v57 = vmul.f32 %v441_v33, %v377_v46 }
  0xc3   : > { %v475_v7 = vadd.f32 %v469_v54, %v451_v55  ;;  %v476_v12 = vadd.f32 %v470_v56, %v452_v57 }
  0xc4   : > { %v445_v36 = vpop.permute.xlu0 %444 }
  0xc5   : > { %v423_v29 = vpop.permute.xlu1 %422  ;;  %v453_v31 = vmul.f32 %v445_v36, %v373_v45  ;;  %v454_v28 = vmul.f32 %v445_v36, %v377_v46 }
  0xc6   : > { %v1500_v5 = vadd.f32 %v423_v29, %v415_v58  ;;  %v1504_v11 = vadd.f32 %v423_v29, %v416_v59 }
  0xc8   : > { %v499_v21 = vsub.f32 1.0, %v1500_v5  ;;  %v500_v27 = vsub.f32 1.0, %v1504_v11  ;;  %vm571_vm6 = vcmp.ge.f32.partialorder %v1500_v5, 0.0  ;;  %vm572_vm7 = vcmp.ge.f32.partialorder %v1504_v11, 0.0 }
  0xc9   : > { %v1467_v30 = vpop.permute.xlu1 %430  ;;  %v483_v42 = vpop.permute.xlu0 %482 }
  0xca   : > { %v1506_v13 = vadd.f32 %v483_v42, %v475_v7  ;;  %v1508_v16 = vadd.f32 %v483_v42, %v476_v12  ;;  %v1517_v33 = vadd.f32 %v1467_v30, %v419_v15  ;;  %v1531_v45 = vadd.f32 %v1467_v30, %v420_v22 }
  0xcc   : > { %v1520_v23 = vsub.f32 %v499_v21, %v1506_v13  ;;  %v1523_v42 = vsub.f32 %v500_v27, %v1508_v16  ;;  %vm577_vm4 = vcmp.ge.f32.partialorder %v1506_v13, 0.0  ;;  %vm578_vm5 = vcmp.ge.f32.partialorder %v1508_v16, 0.0 }
  0xcd   : > { %vm1541_vm8 = vmand %vm571_vm6, %vm577_vm4  ;;  %v503_v30 = vsub.f32 1.0, %v1517_v33  ;;  %v504_v60 = vsub.f32 1.0, %v1531_v45  ;;  %vm575_vm2 = vcmp.ge.f32.partialorder %v1517_v33, 0.0  ;;  %vm576_vm3 = vcmp.ge.f32.partialorder %v1531_v45, 0.0 }
  0xce   : > { %v463_v32 = vpop.permute.xlu1 %462  ;;  %v1494_v52 = vpop.permute.xlu0 %520  ;;  %vm589_vm9 = vcmp.ge.f32.partialorder %v1520_v23, 0.0  ;;  %vm584_vm10 = vmand %vm572_vm7, %vm578_vm5  ;;  %vm590_vm11 = vcmp.ge.f32.partialorder %v1523_v42, 0.0 }
  0xcf   : > { %v471_v40 = vmul.f32 %v463_v32, %v402_v43  ;;  %v472_v41 = vmul.f32 %v463_v32, %v406_v44  ;;  %vm1564_vm13 = vmand %vm1541_vm8, %vm589_vm9  ;;  %v527_v18 = vmul.f32 %v1494_v52, %v1517_v33  ;;  %v528_v21 = vmul.f32 %v1494_v52, %v1531_v45 }
  0xd0   : > { %vm1573_vm15 = vmand %vm584_vm10, %vm590_vm11 }
  0xd1   : > { %v477_v44 = vadd.f32 %v471_v40, %v453_v31  ;;  %v478_v54 = vadd.f32 %v472_v41, %v454_v28 }
  0xd3   : > { %v1469_v34 = vpop.permute.xlu1 %426  ;;  %v1498_v0 = vpop.permute.xlu0 %530 }
  0xd4   : > { %v1539_v32 = vadd.f32 %v1469_v34, %v417_v48 }
  0xd6   : > { %v501_v62 = vsub.f32 1.0, %v1539_v32 }
  0xd8   : > { %v1474_v37 = vpop.permute.xlu1 %490  ;;  %v1511_v26 = vpop.permute.xlu0 %556 }
  0xd9   : > { %v1527_v50 = vadd.f32 %v1474_v37, %v479_v24  ;;  %v1534_v43 = vadd.f32 %v1474_v37, %v480_v25  ;;  %v1548_v37 = vadd.f32 %v1469_v34, %v418_v49 }
  0xdb   : > { %v1557_v57 = vsub.f32 %v503_v30, %v1527_v50  ;;  %vm581_vm12 = vcmp.ge.f32.partialorder %v1527_v50, 0.0  ;;  %vm582_vm14 = vcmp.ge.f32.partialorder %v1534_v43, 0.0  ;;  %v502_v7 = vsub.f32 1.0, %v1548_v37 }
  0xdc   : > { %vm1587_vm4 = vmand %vm575_vm2, %vm581_vm12  ;;  %v563_v31 = vmul.f32 %v1511_v26, %v1527_v50  ;;  %v564_v28 = vmul.f32 %v1511_v26, %v1534_v43 }
  0xdd   : > { %v1492_v47 = vpop.permute.xlu1 %512  ;;  %v606_v51 = vpop.permute.xlu0 %605  ;;  %vm1593_vm5 = vmand %vm576_vm3, %vm582_vm14  ;;  %vm593_vm6 = vcmp.ge.f32.partialorder %v1557_v57, 0.0  ;;  %vm574_vm14 = vcmp.ge.f32.partialorder %v1548_v37, 0.0 }
  0xde   : > { %v523_v55 = vmul.f32 %v1492_v47, %v1500_v5  ;;  %v524_v34 = vmul.f32 %v1492_v47, %v1504_v11  ;;  %vm613_vm1 = vcmp.eq.s32.totalorder %v606_v51, 1  ;;  %vm1628_vm12 = vmand %vm1587_vm4, %vm593_vm6 }
  0xdf   : > { %vm1605_vm7 = vmand %vm1564_vm13, %vm613_vm1  ;;  %vm573_vm13 = vcmp.ge.f32.partialorder %v1539_v32, 0.0 }
  0xe0   : > { %v541_v9 = vadd.f32 %v1498_v0, %v523_v55  ;;  %v542_v14 = vadd.f32 %v1498_v0, %v524_v34  ;;  %vm1618_vm9 = vmand %vm1573_vm15, %vm613_vm1 }
  0xe2   : > { %v1496_v53 = vpop.permute.xlu1 %486 }
  0xe3   : > { %v1554_v56 = vadd.f32 %v1496_v53, %v477_v44  ;;  %v1569_v59 = vadd.f32 %v1496_v53, %v478_v54  ;;  %v1582_v53 = vsub.f32 %v504_v60, %v1534_v43 }
  0xe5   : > { %v1599_v12 = vsub.f32 %v501_v62, %v1554_v56  ;;  %v1610_v17 = vsub.f32 %v502_v7, %v1569_v59  ;;  %vm579_vm8 = vcmp.ge.f32.partialorder %v1554_v56, 0.0  ;;  %vm580_vm10 = vcmp.ge.f32.partialorder %v1569_v59, 0.0 }
  0xe6   : > { %vm594_vm11 = vcmp.ge.f32.partialorder %v1582_v53, 0.0  ;;  %vm585_vm15 = vmand %vm573_vm13, %vm579_vm8 }
  0xe7   : > { %v1502_v8 = vpop.permute.xlu1 %516  ;;  %vm591_vm1 = vcmp.ge.f32.partialorder %v1599_v12, 0.0  ;;  %vm586_vm2 = vmand %vm574_vm14, %vm580_vm10  ;;  %vm592_vm3 = vcmp.ge.f32.partialorder %v1610_v17, 0.0 }
  0xe8   : > { %vm1642_vm6 = vmand %vm1593_vm5, %vm594_vm11  ;;  %v526_v44 = vmul.f32 %v1502_v8, %v1548_v37 }
  0xe9   : > { %vm1648_vm13 = vmand %vm585_vm15, %vm591_vm1 }
  0xea   : > { %vm1655_vm10 = vmand %vm586_vm2, %vm592_vm3 }
  0xec   : > { %v1514_v29 = vpop.permute.xlu1 %538 }
  0xed   : > { %v545_v25 = vadd.f32 %v1514_v29, %v527_v18  ;;  %v546_v52 = vadd.f32 %v1514_v29, %v528_v21  ;;  %v525_v29 = vmul.f32 %v1502_v8, %v1539_v32 }
  0xef   : > { %v569_v48 = vadd.f32 %v563_v31, %v545_v25  ;;  %v1001_v31 = vld [vmem:[#allocation2] sm:$0x3] }
  0xf1   : > { %v549_v46 = vpop.permute.xlu1 %548 }
  0xf2   : > { %v559_v47 = vmul.f32 %v549_v46, %v1506_v13  ;;  %v560_v63 = vmul.f32 %v549_v46, %v1508_v16  ;;  %v570_v46 = vadd.f32 %v564_v28, %v546_v52  ;;  %v1378_v28 = vmov 1966171168  }
  0xf3   : > { %v1021_v41 = vunpack.c.l.s4 %v1378_v28 }
  0xf4   : > { %v565_v19 = vadd.f32 %v559_v47, %v541_v9  ;;  %v566_v22 = vadd.f32 %v560_v63, %v542_v14  ;;  %vm627_vm2 = vcmp.gt.f32.partialorder %v570_v46, 0.0  ;;  %v1225_v9 = vld [vmem:[%s1459_s26 + $0x10] sm:$0xff] }
  0xf6   : > { %v535_v2 = vpop.permute.xlu1 %534  ;;  %vm622_vm4 = vcmp.gt.f32.partialorder %v565_v19, 0.0  ;;  %vm623_vm8 = vcmp.gt.f32.partialorder %v566_v22, 0.0 }
  0xf7   : > { %vm1664_vm5 = vmand %vm1605_vm7, %vm622_vm4  ;;  %v543_v54 = vadd.f32 %v535_v2, %v525_v29  ;;  %v544_v34 = vadd.f32 %v535_v2, %v526_v44  ;;  %vm626_vm7 = vcmp.gt.f32.partialorder %v569_v48, 0.0  ;;  %v671_v44 = vadd.s32 16, %v1472_v35 }
  0xf8   : > { %vm1670_vm14 = vmand %vm1618_vm9, %vm623_vm8  ;;  %v634_v2 = vsel %vm1664_vm5, %v565_v19, 1e+30 }
  0xf9   : > { %v635_v4 = vsel %vm1670_vm14, %v566_v22, 1e+30 }
  0xfb   : > { %v553_v27 = vpop.permute.xlu1 %552 }
  0xfc   : > { %v561_v49 = vmul.f32 %v553_v27, %v1554_v56  ;;  %v562_v26 = vmul.f32 %v553_v27, %v1569_v59 }
  0xfe   : > { %v567_v8 = vadd.f32 %v561_v49, %v543_v54  ;;  %v568_v58 = vadd.f32 %v562_v26, %v544_v34  ;;  %v1711_v49 = vrot.slane %v1001_v31, %v1477_v38  ;;  %v1717_v26 = vrot.slane %v1001_v31, %v1480_v39 }
  0xff   : > { %v670_v54 = vadd.s32 8, %v1472_v35 }
 0x100   : > { %v612_v30 = vpop.permute.xlu1 %611  ;;  %vm624_vm8 = vcmp.gt.f32.partialorder %v567_v8, 0.0 }
 0x101   : > { %vm615_vm11 = vcmp.eq.s32.totalorder %v612_v30, 1  ;;  %v1022_v30 = vunpack.c.0.s8 %v1021_v41 }
 0x102   : > { %vm620_vm15 = vmand %vm1628_vm12, %vm615_vm11 }
 0x103   : > { %vm621_vm1 = vmand %vm1642_vm6, %vm615_vm11  ;;  %vm625_vm11 = vcmp.gt.f32.partialorder %v568_v58, 0.0  ;;  %v1025_v51 = vsub.s32 %v1022_v30, %v1472_v35 }
 0x104   : > { %vm1678_vm3 = vmand %vm620_vm15, %vm626_vm7  ;;  %v609_v61 = vpop.permute.xlu1 %608 }
 0x105   : > { %vm1682_vm9 = vmand %vm621_vm1, %vm627_vm2  ;;  %v638_v62 = vsel %vm1678_vm3, %v569_v48, 1e+30  ;;  %vm614_vm12 = vcmp.eq.s32.totalorder %v609_v61, 1  ;;  %v674_v61 = vcvt.s32.f32 %v671_v44 }
 0x106   : > { %v639_v63 = vsel %vm1682_vm9, %v570_v46, 1e+30  ;;  %vm618_vm4 = vmand %vm1648_vm13, %vm614_vm12  ;;  %v640_v7 = vmin.f32 %v634_v2, %v638_v62 }
 0x107   : > { %vm619_vm6 = vmand %vm1655_vm10, %vm614_vm12  ;;  %v648_v10 = vmin.f32 %v635_v4, %v639_v63 }
 0x108   : > { %vm1698_vm15 = vmand %vm618_vm4, %vm624_vm8 }
 0x109   : > { %vm1702_vm1 = vmand %vm619_vm6, %vm625_vm11  ;;  %v636_v15 = vsel %vm1698_vm15, %v567_v8, 1e+30  ;;  %v1723_v8 = vcvt.s32.f32 %v1472_v35 }
 0x10a   : > { %v637_v18 = vsel %vm1702_vm1, %v568_v58, 1e+30  ;;  %v641_v0 = vmin.f32 %v640_v7, %v636_v15 }
 0x10b   : > { %v649_v19 = vmin.f32 %v648_v10, %v637_v18 }
 0x10c   : > { %v642_v21 = vrot.slane %v641_v0, 4 }
 0x10d   : > { %v650_v22 = vrot.slane %v649_v19, 4 }
 0x10e   : > { %v643_v24 = vmin.f32 %v641_v0, %v642_v21 }
 0x10f   : > { %v651_v25 = vmin.f32 %v649_v19, %v650_v22 }
 0x110   : > { %v644_v27 = vrot.slane %v643_v24, 2 }
 0x111   : > { %v652_v52 = vrot.slane %v651_v25, 2 }
 0x112   : > { %v645_v40 = vmin.f32 %v643_v24, %v644_v27 }
 0x113   : > { %v653_v29 = vmin.f32 %v651_v25, %v652_v52 }
 0x114   : > { %v646_v48 = vrot.slane %v645_v40, 1 }
 0x115   : > { %v654_v36 = vrot.slane %v653_v29, 1 }
 0x116   : > { %v1714_v46 = vmin.f32 %v645_v40, %v646_v48 }
 0x117   : > { %v1720_v34 = vmin.f32 %v653_v29, %v654_v36 }
 0x118   : > { %vm656_vm13 = vcmp.le.f32.partialorder %v634_v2, %v1714_v46  ;;  %vm658_vm10 = vcmp.le.f32.partialorder %v636_v15, %v1714_v46  ;;  %vm1890_vm7 = vcmp.lt.f32.partialorder %v1714_v46, %v1711_v49  ;;  %vm660_vm6 = vcmp.le.f32.partialorder %v638_v62, %v1714_v46 }
 0x119   : > { %vm657_vm2 = vcmp.le.f32.partialorder %v635_v4, %v1720_v34  ;;  %vm659_vm12 = vcmp.le.f32.partialorder %v637_v18, %v1720_v34  ;;  %vm1733_vm4 = vmand %vm1664_vm5, %vm656_vm13  ;;  %v1015_v58 = vsel %vm1890_vm7, %v1714_v46, %v1711_v49  ;;  %vm1889_vm5 = vcmp.lt.f32.partialorder %v1720_v34, %v1717_v26 }
 0x11a   : > { %vm1745_vm8 = vmand %vm1670_vm14, %vm657_vm2  ;;  %vm661_vm11 = vcmp.le.f32.partialorder %v639_v63, %v1720_v34  ;;  %v1016_v55 = vsel %vm1889_vm5, %v1720_v34, %v1717_v26  ;;  %v673_v62 = vcvt.s32.f32 %v670_v54  ;;  %v675_v35 = vsel %vm1733_vm4, %v1723_v8, 24.0 }
 0x11b   : > { %vm1755_vm13 = vmand %vm1698_vm15, %vm658_vm10  ;;  %v1019_v63 = vcombine.low %v1015_v58, %v1016_v55  ;;  %v676_v10 = vsel %vm1745_vm8, %v1723_v8, 24.0 }
 0x11c   : > { %vm1766_vm14 = vmand %vm1702_vm1, %vm659_vm12  ;;  %v677_v19 = vsel %vm1755_vm13, %v673_v62, 24.0 }
 0x11d   : > { %vm1775_vm15 = vmand %vm1678_vm3, %vm660_vm6  ;;  %v1026_v18 = vrot.slane %v1019_v63, %v1025_v51  ;;  %v678_v47 = vsel %vm1766_vm14, %v673_v62, 24.0 }
 0x11e   : > { %vm1784_vm1 = vmand %vm1682_vm9, %vm661_vm11  ;;  %v679_v15 = vsel %vm1775_vm15, %v674_v61, 24.0 }
 0x11f   : > { %v680_v60 = vsel %vm1784_vm1, %v674_v61, 24.0  ;;  %v681_v0 = vmin.f32 %v675_v35, %v679_v15  ;;  %v1033_v22 = vrot.slane %v1026_v18, %v1025_v51 }
 0x120   : > { %v689_v21 = vmin.f32 %v676_v10, %v680_v60  ;;  %v721_v10 = vld [vmem:[%s1459_s26] sm:$0xff] }
 0x121   : > { %v682_v24 = vmin.f32 %v681_v0, %v677_v19  ;;  %1039 = vst.msk [vmem:[#allocation2] sm:$0x3] %vm1434_vm0, %v1033_v22 }
 0x122   : > { %v690_v25 = vmin.f32 %v689_v21, %v678_v47 }
 0x123   : > { %v683_v27 = vrot.slane %v682_v24, 4 }
 0x124   : > { %v691_v52 = vrot.slane %v690_v25, 4 }
 0x125   : > { %v684_v31 = vmin.f32 %v682_v24, %v683_v27  ;;  %v1040_v27 = vld [vmem:[%s1443_s12] sm:$0xff] }
 0x126   : > { %v692_v40 = vmin.f32 %v690_v25, %v691_v52 }
 0x127   : > { %v685_v28 = vrot.slane %v684_v31, 2 }
 0x128   : > { %v693_v41 = vrot.slane %v692_v40, 2 }
 0x129   : > { %v686_v29 = vmin.f32 %v684_v31, %v685_v28  ;;  %v1041_v28 = vld [vmem:[%s1443_s12 + $0x8] sm:$0xff] }
 0x12a   : > { %v694_v48 = vmin.f32 %v692_v40, %v693_v41 }
 0x12b   : > { %v687_v36 = vrot.slane %v686_v29, 1 }
 0x12c   : > { %v695_v44 = vrot.slane %v694_v48, 1 }
 0x12d   : > { %v688_v30 = vmin.f32 %v686_v29, %v687_v36  ;;  %v1043_v29 = vld [vmem:[%s1443_s12 + $0x18] sm:$0xf] }
 0x12e   : > { %v696_v54 = vmin.f32 %v694_v48, %v695_v44 }
 0x12f   : > { %vm699_vm3 = vcmp.eq.f32.partialorder %v673_v62, %v688_v30  ;;  %vm701_vm12 = vcmp.eq.f32.partialorder %v674_v61, %v688_v30  ;;  %vm697_vm7 = vcmp.eq.f32.partialorder %v1723_v8, %v688_v30 }
 0x130   : > { %vm700_vm9 = vcmp.eq.f32.partialorder %v673_v62, %v696_v54  ;;  %vm705_vm10 = vmand %vm699_vm3, %vm1755_vm13  ;;  %vm702_vm2 = vcmp.eq.f32.partialorder %v674_v61, %v696_v54  ;;  %vm698_vm11 = vcmp.eq.f32.partialorder %v1723_v8, %v696_v54 }
 0x131   : > { %vm706_vm6 = vmand %vm700_vm9, %vm1766_vm14  ;;  %v1221_v4 = vsel %vm705_vm10, 1.0, %v1377_v20 }
 0x132   : > { %vm708_vm5 = vmand %vm702_vm2, %vm1784_vm1  ;;  %v1222_v58 = vsel %vm706_vm6, 1.0, %v1377_v20 }
 0x133   : > { %v1224_v51 = vsel %vm708_vm5, 1.0, %v1377_v20  ;;  %vm707_vm0 = vmand %vm701_vm12, %vm1775_vm15 }
 0x134   : > { %v737_v61 = vmul.f32 %v1224_v51, %v1534_v43  ;;  %v728_v55 = vmul.f32 %v1224_v51, %v1531_v45  ;;  %v1223_v62 = vsel %vm707_vm0, 1.0, %v1377_v20  ;;  %vm704_vm13 = vmand %vm698_vm11, %vm1745_vm8  ;;  %v735_v43 = vmul.f32 %v1222_v58, %v1569_v59 }
 0x135   : > { %v736_v8 = vmul.f32 %v1223_v62, %v1527_v50  ;;  %v727_v7 = vmul.f32 %v1223_v62, %v1517_v33  ;;  %v1220_v35 = vsel %vm704_vm13, 1.0, %v1377_v20  ;;  %vm703_vm5 = vmand %vm697_vm7, %vm1733_vm4  ;;  %v726_v45 = vmul.f32 %v1222_v58, %v1548_v37 }
 0x136   : > { %771 = vmatprep.subr.mxu0 %v737_v61  ;;  %854 = vmatprep.subr.mxu1 %v728_v55  ;;  %v1219_v2 = vsel %vm703_vm5, 1.0, %v1377_v20  ;;  %v734_v50 = vmul.f32 %v1221_v4, %v1554_v56  ;;  %v725_v33 = vmul.f32 %v1221_v4, %v1539_v32  ;;  %v733_v39 = vmul.f32 %v1220_v35, %v1508_v16  ;;  %v722_v56 = vld [vmem:[%s1459_s26 + $0x8] sm:$0xf] }
 0x137   : > { %772 = vmatpush1.msra.mxu0 %v736_v8  ;;  %855 = vmatpush1.msra.mxu1 %v727_v7  ;;  %v724_v63 = vmul.f32 %v1220_v35, %v1504_v11  ;;  %v732_v59 = vmul.f32 %v1219_v2, %v1506_v13  ;;  %v723_v37 = vmul.f32 %v1219_v2, %v1500_v5  ;;  %vm738_vm0 = vcmask 195584   ;;  %v1226_v13 = vld [vmem:[%s1459_s26 + $0x18] sm:$0xf] }
 0x138   : > { %773 = vmatprep.subr.mxu0 %v735_v43  ;;  %856 = vmatprep.subr.mxu1 %v726_v45  ;;  %v913_v32 = vmul.f32 %v1224_v51, %v1582_v53  ;;  %v912_v16 = vmul.f32 %v1223_v62, %v1557_v57  ;;  %v911_v5 = vmul.f32 %v1222_v58, %v1610_v17  ;;  %v1232_v17 = vld [vmem:[%s1459_s26 + $0x28] sm:$0xf] }
 0x139   : > { %774 = vmatpush1.msra.mxu0 %v734_v50  ;;  %857 = vmatpush1.msra.mxu1 %v725_v33  ;;  %v910_v11 = vmul.f32 %v1221_v4, %v1599_v12  ;;  %v909_v57 = vmul.f32 %v1220_v35, %v1523_v42  ;;  %v908_v53 = vmul.f32 %v1219_v2, %v1520_v23  ;;  %v1231_v12 = vld [vmem:[%s1459_s26 + $0x20] sm:$0xff] }
 0x13a   : > { %775 = vmatprep.subr.mxu0 %v733_v39  ;;  %858 = vmatprep.subr.mxu1 %v724_v63  ;;  %vm1940_vm7 = vcmp.lt.f32.partialorder %v1714_v46, %v1711_v49  ;;  %vm1941_vm4 = vcmp.lt.f32.partialorder %v1720_v34, %v1717_v26  ;;  %v1042_v49 = vld [vmem:[%s1443_s12 + $0x10] sm:$0xf] }
 0x13b   : > { %776 = vmatpush1.msra.mxu0 %v732_v59  ;;  %859 = vmatpush1.msra.mxu1 %v723_v37  ;;  %v1044_v18 = vsel %vm1940_vm7, 1, %v1368_v6 }
 0x13c   : > { %1227 = vmatmul.mubr.msk.f32.vlgmr.msra.gmra.mxu0 %vm738_vm0, %v1225_v9  ;;  %1229 = vmatmul.mubr.msk.f32.vlgmr.msra.gmra.mxu1 %vm738_vm0, %v721_v10  ;;  %v1049_v22 = vrot.slane %v1044_v18, %v1477_v38 }
 0x13d   : > { %946 = vmatprep.subr.mxu0 %v913_v32  ;;  %1240 = vmatprep.subr.mxu1 %v913_v32 }
 0x13e   : > { %947 = vmatpush1.msra.mxu0 %v912_v16  ;;  %1243 = vmatpush1.msra.mxu1 %v912_v16  ;;  %vm1054_vm8 = vcmp.eq.s32.totalorder %v1049_v22, 1 }
 0x13f   : > { %948 = vmatprep.subr.mxu0 %v911_v5  ;;  %1241 = vmatprep.subr.mxu1 %v911_v5 }
 0x140   : > { %815 = vmatprep.mubr.f32.mxu0 %v1377_v20  ;;  %898 = vmatprep.mubr.f32.mxu1 %v1377_v20 }
 0x141   : > { %949 = vmatpush1.msra.mxu0 %v910_v11  ;;  %1244 = vmatpush1.msra.mxu1 %v910_v11 }
 0x142   : > { %1228 = vmatmul.mubr.msk.f32.gmra.mxu0 %vm738_vm0, %v1226_v13  ;;  %1230 = vmatmul.mubr.msk.f32.gmra.mxu1 %vm738_vm0, %v722_v56 }
 0x143   : > { %950 = vmatprep.subr.mxu0 %v909_v57  ;;  %1242 = vmatprep.subr.mxu1 %v909_v57 }
 0x144   : > { %951 = vmatpush1.msra.mxu0 %v908_v53  ;;  %1245 = vmatpush1.msra.mxu1 %v908_v53 }
 0x145   : > { %984 = vmatprep.mubr.f32.mxu0 %v1377_v20  ;;  %990 = vmatprep.mubr.f32.mxu1 %v1377_v20  ;;  %v1045_v20 = vsel %vm1941_vm4, 1, %v1368_v6 }
 0x146   : > { %1233 = vmatmul.mubr.msk.f32.vlgmr.msra.gmra.mxu0 %vm738_vm0, %v1231_v12  ;;  %1234 = vmatmul.mubr.msk.f32.vlgmr.msra.gmra.mxu1 %vm738_vm0, %v1232_v17  ;;  %v1053_v46 = vrot.slane %v1045_v20, %v1477_v38 }
 0x148   : > { %vm1055_vm14 = vcmp.eq.s32.totalorder %v1053_v46, 1 }
 0x1fc   : > { %v811_v42 = vpop.f32.mrf.mxu0  ;;  %v894_v14 = vpop.f32.mrf.mxu1 }
 0x1fd   : > { %v895_v47 = vadd.f32 %v894_v14, %v811_v42 }
 0x1fe   : > { %v813_v15 = vpop.f32.mrf.mxu0  ;;  %v896_v23 = vpop.f32.mrf.mxu1 }
 0x1ff   : > { %v897_v31 = vadd.f32 %v896_v23, %v813_v15 }
 0x202   : > { %v817_v60 = vpop.f32.mrf.mxu0  ;;  %v900_v0 = vpop.f32.mrf.mxu1 }
 0x203   : > { %v901_v24 = vadd.f32 %v900_v0, %v817_v60 }
 0x204   : > { %v819_v19 = vpop.f32.mrf.mxu0  ;;  %v902_v21 = vpop.f32.mrf.mxu1 }
 0x205   : > { %v903_v40 = vadd.f32 %v902_v21, %v819_v19 }
 0x206   : > { %v986_v25 = vpop.f32.mrf.mxu0  ;;  %v992_v52 = vpop.f32.mrf.mxu1 }
 0x207   : > { %v997_v26 = vadd.f32 %v986_v25, %v895_v47  ;;  %v999_v6 = vadd.f32 %v992_v52, %v901_v24 }
 0x208   : > { %v988_v34 = vpop.f32.mrf.mxu0  ;;  %v994_v41 = vpop.f32.mrf.mxu1 }
 0x209   : > { %v1056_v48 = vsel %vm1054_vm8, %v997_v26, %v1040_v27  ;;  %v1058_v36 = vsel %vm1054_vm8, %v999_v6, %v1042_v49  ;;  %v998_v44 = vadd.f32 %v988_v34, %v897_v31  ;;  %v1000_v30 = vadd.f32 %v994_v41, %v903_v40 }
 0x20a   : > { %1060 = vst [vmem:[%s1443_s12] sm:$0xff] %v1056_v48  ;;  %1062 = vst [vmem:[%s1443_s12 + $0x10] sm:$0xf] %v1058_v36 }
 0x20b   : > { %v1057_v54 = vsel %vm1055_vm14, %v998_v44, %v1041_v28  ;;  %v1059_v38 = vsel %vm1055_vm14, %v1000_v30, %v1043_v29 }
 0x20c   : > { %1061 = vst [vmem:[%s1443_s12 + $0x8] sm:$0xff] %v1057_v54  ;;  %1063 = vst [vmem:[%s1443_s12 + $0x18] sm:$0xf] %v1059_v38 }
 0x20d PF: > { %v1067_v58 = vld [vmem:[#allocation2] sm:$0x3]  ;;  %vm1942_vm1 = vnez %v1893_v1 }
 0x20e   : > { %vm1068_vm15 = vcmp.lt.f32.partialorder %v1067_v58, 1e+29 }
 0x20f   : > { %v1235_v51 = vsel %vm1068_vm15, 1.0, %v1366_v3 }
 0x210   : > { %1236 = vst.msk [vmem:[%s1443_s12 + $0x14] ss:$8 sm:$0x3] %vm1942_vm1, %v1235_v51 }
 0x211 PF: > { %s25_s28 = sadd.s32 1, %s1361_s28   ;;  %s1943_s1 = smov %s1357_s27 }
 0x212   : > { %p22_p4 = scmp.ge.s32.totalorder %s25_s28, 4   ;;  %s1944_s27 = smov %s1946_s29 }
 0x214   :  { %24 = sbr.rel (!%p22_p4) target bundleno = 27 (0x1b), region = 84 }

</bundles_post_ra>
